<compile_context>
chip_gen: v5e
topology: v5e:2x2
jax: 0.10.0
libtpu: 0.0.40
codegen_flags: <defaults>
</compile_context>

<pallas_src>
import numpy as np
import jax
import jax.numpy as jnp
from jax.experimental import pallas as pl
from jax.experimental.pallas import tpu as pltpu


def _reward_head_kernel(b_ref, x_ref, w_ref, o_ref):
    # b_ref: (1,) f32 bias in SMEM (scalar prefetch)
    # x_ref: (tm, H) activation tile (streamed); w_ref: (H, 1) weight (resident)
    # o_ref: (tm, 1) output tile
    acc = jnp.dot(x_ref[...], w_ref[...], preferred_element_type=jnp.float32)
    o_ref[...] = (acc + b_ref[0]).astype(o_ref.dtype)


def _round_up(x, m):
    return ((x + m - 1) // m) * m


def _cdiv(a, b):
    return -(-a // b)


def _vmem_budgets():
    """Return (tile working-set budget, scoped-VMEM limit cap) per TPU generation."""
    try:
        kind = jax.devices()[0].device_kind.lower()
    except Exception:
        kind = ""
    if any(v in kind for v in ("v4", "v5", "v6")):
        # 128 MiB physical VMEM per TensorCore: bigger tiles, fewer grid steps.
        return 56 << 20, 96 << 20
    # v7x (64 MiB per TC) and unknown chips: stay conservative.
    return 24 << 20, 48 << 20


def reward_head(hidden_states, weight, bias, *,
                compute_dtype=None,
                max_tm=4096,
                vmem_budget_bytes=None,
                vmem_limit_cap_bytes=None):
    """nn.Linear(hidden_size, 1) forward.

    hidden_states: (..., H); weight: (1, H) torch layout (also accepts (H, 1)
    or (H,)); bias: any single-element shape.  Returns (..., 1) in
    hidden_states.dtype.  compute_dtype is an explicit opt-in (e.g. bf16) and
    changes numerics; by default the native dtype is streamed unmodified.
    """
    orig_shape = hidden_states.shape
    out_dtype = hidden_states.dtype
    H = orig_shape[-1]

    default_budget, default_cap = _vmem_budgets()
    if vmem_budget_bytes is None:
        vmem_budget_bytes = default_budget
    if vmem_limit_cap_bytes is None:
        vmem_limit_cap_bytes = default_cap

    # --- flatten tokens, normalize parameter shapes (no HBM pass over x) ----
    x = hidden_states.reshape(-1, H)
    M = x.shape[0]

    w = jnp.asarray(weight)
    if w.ndim == 2 and w.shape == (1, H):      # torch nn.Linear stores (out, in)
        w = w.T
    w = w.reshape(H, 1)
    b = jnp.asarray(bias).reshape(1).astype(jnp.float32)

    # Optional explicit opt-in lower-precision path (changes numerics).
    if compute_dtype is not None:
        x = x.astype(compute_dtype)
    w = w.astype(x.dtype)                       # tiny (H elements), negligible

    itemsize = np.dtype(x.dtype).itemsize
    w_itemsize = np.dtype(w.dtype).itemsize
    out_itemsize = np.dtype(out_dtype).itemsize

    # --- VMEM footprints of lane-padded blocks ------------------------------
    Hl = _round_up(H, 128)                                    # x lane padding
    w_block_bytes = _round_up(H, 16) * 128 * w_itemsize       # (H, 1) block
    out_row_bytes = 128 * max(out_itemsize, 4)                # (tm, 1) block row
    x_row_bytes = Hl * itemsize

    # --- pick token tile against the double-buffered VMEM budget ------------
    avail = max(vmem_budget_bytes - 2 * w_block_bytes, 1 << 20)
    per_row = 2 * x_row_bytes + 2 * out_row_bytes             # dbl-buffered
    tm = min(max_tm, max(8, avail // per_row))
    tm = max(8, (tm // 8) * 8)

    # --- grid: ragged last block (no padding), >=2 balanced steps -----------
    n_steps = _cdiv(M, tm)
    if n_steps == 1 and M > 8:
        n_steps = 2                 # let both v7x TensorCores participate
    if n_steps > 1 and n_steps % 2 == 1:
        n_steps += 1                # even split across 2 cores
    tm = max(8, _round_up(_cdiv(M, n_steps), 8))
    grid = (_cdiv(M, tm),)

    # --- exact VMEM need (incl. lane-padded narrow blocks) -------------------
    vmem_needed = (2 * tm * x_row_bytes
                   + 2 * w_block_bytes
                   + 2 * _round_up(tm, 16) * out_row_bytes)
    vmem_limit = int(min(max(vmem_needed + (8 << 20), 32 << 20),
                         vmem_limit_cap_bytes))

    cost = pl.CostEstimate(
        flops=2 * M * H,
        transcendentals=0,
        bytes_accessed=M * H * itemsize + H * w_itemsize + M * out_itemsize,
    )

    out = pl.pallas_call(
        _reward_head_kernel,
        out_shape=jax.ShapeDtypeStruct((M, 1), out_dtype),
        grid_spec=pltpu.PrefetchScalarGridSpec(
            num_scalar_prefetch=1,                            # bias -> SMEM
            grid=grid,
            in_specs=[
                pl.BlockSpec((tm, H), lambda i, b: (i, 0)),   # x tile (streamed)
                pl.BlockSpec((H, 1), lambda i, b: (0, 0)),    # weight (resident)
            ],
            out_specs=pl.BlockSpec((tm, 1), lambda i, b: (i, 0)),
        ),
        compiler_params=pltpu.CompilerParams(
            dimension_semantics=("parallel",),
            vmem_limit_bytes=vmem_limit,
        ),
        cost_estimate=cost,
    )(b, x, w)

    return out.reshape(*orig_shape[:-1], 1)


if __name__ == "__main__":
    # Small shapes consistent with the module: batch=2, seq=8, hidden=32.
    B, S, H = 2, 8, 32
    key = jax.random.PRNGKey(0)
    k_x, k_w, k_b, k_x2 = jax.random.split(key, 4)

    hidden_states = jax.random.normal(k_x, (B, S, H), dtype=jnp.float32)

    # Deterministic nn.Linear-style init: U(-1/sqrt(H), 1/sqrt(H)), torch layout.
    bound = 1.0 / (H ** 0.5)
    weight = jax.random.uniform(k_w, (1, H), minval=-bound, maxval=bound,
                                dtype=jnp.float32)
    bias = jax.random.uniform(k_b, (1,), minval=-bound, maxval=bound,
                              dtype=jnp.float32)

    out = jax.block_until_ready(reward_head(hidden_states, weight, bias))
    assert out.shape == (B, S, 1)

    # f32 reference (tolerance covers possible bf16-pass MXU accumulation).
    ref = (hidden_states.reshape(-1, H) @ weight.T + bias).reshape(B, S, 1)
    assert jnp.allclose(out, ref, atol=1e-2, rtol=1e-2), \
        float(jnp.max(jnp.abs(out - ref)))

    # Ragged token count: exercises the cdiv grid / masked last block path.
    x2 = jax.random.normal(k_x2, (3, 5, H), dtype=jnp.float32)
    out2 = jax.block_until_ready(reward_head(x2, weight, bias))
    ref2 = (x2.reshape(-1, H) @ weight.T + bias).reshape(3, 5, 1)
    assert out2.shape == (3, 5, 1)
    assert jnp.allclose(out2, ref2, atol=1e-2, rtol=1e-2), \
        float(jnp.max(jnp.abs(out2 - ref2)))

    print("KERNEL_OK")
</pallas_src>

<mosaic_0001>
module attributes {stable_mosaic.version = 11 : i64} {
  func.func @_reward_head_kernel(%arg0: i32, %arg1: memref<1xf32, #tpu.memory_space<smem>>, %arg2: memref<8x32xf32, #tpu.memory_space<vmem>>, %arg3: memref<32x1xf32, #tpu.memory_space<vmem>>, %arg4: memref<8x1xf32, #tpu.memory_space<vmem>>) attributes {dimension_semantics = [#tpu.dimension_semantics<parallel>], iteration_bounds = array<i64: 2>, scalar_prefetch = 1 : i64, scratch_operands = 0 : i64, tpu.core_type = #tpu.core_type<tc>, window_params = [{transform_indices = @transform_0, window_bounds = array<i64: 8, 32>}, {pipeline_mode = #tpu.pipeline_mode<synchronous>, transform_indices = @transform_1, window_bounds = array<i64: 32, 1>}, {transform_indices = @transform_2, window_bounds = array<i64: 8, 1>}]} {
    %c0 = arith.constant 0 : index
    %c0_0 = arith.constant 0 : index
    %0 = vector.load %arg2[%c0, %c0_0] : memref<8x32xf32, #tpu.memory_space<vmem>>, vector<8x32xf32>
    %c0_1 = arith.constant 0 : index
    %c0_2 = arith.constant 0 : index
    %1 = vector.load %arg3[%c0_1, %c0_2] : memref<32x1xf32, #tpu.memory_space<vmem>>, vector<32x1xf32>
    %cst = arith.constant dense<0.000000e+00> : vector<8x1xf32>
    %2 = tpu.matmul %0, %1, %cst {dimension_numbers = #tpu.dot_dimension_numbers<[1], [0], [0], [1], [0, 0, 1, 1], [], []>} : vector<8x32xf32>, vector<32x1xf32>, vector<8x1xf32> -> vector<8x1xf32>
    %c0_3 = arith.constant 0 : index
    %3 = memref.load %arg1[%c0_3] : memref<1xf32, #tpu.memory_space<smem>>
    %4 = vector.broadcast %3 : f32 to vector<8x1xf32>
    %5 = arith.addf %2, %4 : vector<8x1xf32>
    %c0_4 = arith.constant 0 : index
    %c0_5 = arith.constant 0 : index
    %6 = vector.load %arg4[%c0_4, %c0_5] : memref<8x1xf32, #tpu.memory_space<vmem>>, vector<8x1xf32>
    tpu.vector_store %arg4[%c0_4, %c0_5], %5 {strides = array<i32>} : memref<8x1xf32, #tpu.memory_space<vmem>>, vector<8x1xf32>,
    return
  }
  func.func @transform_0(%arg0: i32, %arg1: memref<1xf32, #tpu.memory_space<smem>>) -> (i32, i32) {
    %c0_i32 = arith.constant 0 : i32
    %c0_i32_0 = arith.constant 0 : i32
    return %arg0, %c0_i32 : i32, i32
  }
  func.func @transform_1(%arg0: i32, %arg1: memref<1xf32, #tpu.memory_space<smem>>) -> (i32, i32) {
    %c0_i32 = arith.constant 0 : i32
    %c0_i32_0 = arith.constant 0 : i32
    %c0_i32_1 = arith.constant 0 : i32
    return %c0_i32, %c0_i32_0 : i32, i32
  }
  func.func @transform_2(%arg0: i32, %arg1: memref<1xf32, #tpu.memory_space<smem>>) -> (i32, i32) {
    %c0_i32 = arith.constant 0 : i32
    %c0_i32_0 = arith.constant 0 : i32
    return %arg0, %c0_i32 : i32, i32
  }
}

</mosaic_0001>

<bundles_post_ra>
// kernel: tpu_custom_call.1
= control target key start
LH: loop header
LB: loop body
LE: loop exit
PB: predicated region body
PF: predicated region fallthrough
CT: control target
= control target key end

     0   :  { %s276_s14 = smov 0   ;;  %s305_s0 = inlined_call_operand.<no memory space> [shape: f32[1], index: 0, kind: input, shape index: {}]   ;;  %s306_s1 = inlined_call_operand.vmem [shape: f32[16,32], index: 1, kind: input, shape index: {}]   ;;  %s307_s2 = inlined_call_operand.vmem [shape: f32[32,1], index: 2, kind: input, shape index: {}]   ;;  %s308_s3 = inlined_call_operand.vmem [shape: f32[16,1], index: 3, kind: output, shape index: {}]  }
   0x1   :  { %8 = sst [smem:[#allocation3]] %s305_s0 }
   0x2 LB: > { %s227_s15 = sadd.s32 4294967295, %s251_s14   ;;  %p231_p0 = scmp.ge.s32.totalorder %s251_s14, 1  ;;  %s251_s14 = sphi %s276_s14, %s14_s14  }
   0x3   : > { %p113_p1 = scmp.lt.s32.totalorder %s251_s14, 3 }
   0x5   : > { %p114_p2 = pnand %p231_p0, %p113_p1 }
   0x6   : > { %p133_p3 = scmp.lt.s32.totalorder (!%p114_p2), %s227_s15, 1  ;;  %s146_s27 = sld [smem:[#allocation3]] (!%p114_p2) }
   0x7   : > { %117 = sbr.rel (%p114_p2) target bundleno = 149 (0x95), region = 28 }
   0xc   : > { %v145_v0 = vld [vmem:[%s307_s2 + $0x18] sm:$0xff]  ;;  %v144_v1 = vld [vmem:[%s307_s2 + $0x10] sm:$0xff]  ;;  %v143_v2 = vld [vmem:[%s307_s2 + $0x8] sm:$0xff]  ;;  %s310_s15 = smov (!%p133_p3, %s227_s15), 1  ;;  %vm148_vm0 = vcmask 261120   ;;  %v147_v5 = vstv %s146_s27  ;;  %vm172_vm1 = vcmask 7168  }
   0xd   : > { %164 = vmatpush.msra.mxu0 %v145_v0  ;;  %v142_v3 = vld [vmem:[%s307_s2] sm:$0xff]  ;;  %s232_s23 = sshll.u32 %s310_s15, 3 }
   0xe   : > { %s136_s26 = scalar_lea.vmem %s306_s1, %s232_s23  ;;  %s140_s30 = scalar_lea.vmem %s308_s3, %s232_s23 }
   0xf   : > { %165 = vmatpush.msra.mxu0 %v144_v1  ;;  %v141_v4 = vld [vmem:[%s136_s26] sm:$0xff] }
  0x11   : > { %166 = vmatpush.msra.mxu0 %v143_v2 }
  0x13   : > { %167 = vmatpush.msra.mxu0 %v142_v3 }
  0x14   : > { %234 = vmatmul.msk.f32.vlgmr.msra.gmra.mxu0 %vm148_vm0, %v141_v4 }
  0x91   : > { %v169_v6 = vpop.f32.mrf.mxu0 }
  0x92   : > { %v170_v7 = vadd.f32 %v169_v6, %v147_v5 }
  0x94   : > { %173 = vst.msk [vmem:[%s140_s30] sm:$0xff] %vm172_vm1, %v170_v7 }
  0x95 PF: > { %s14_s14 = sadd.s32 1, %s251_s14  }
  0x96   : > { %p11_p4 = scmp.ge.s32.totalorder %s14_s14, 4  }
  0x98   :  { %13 = sbr.rel (!%p11_p4) target bundleno = 2 (0x2), region = 58 }

</bundles_post_ra>
